<compile_context>
chip_gen: v7x
topology: tpu7x:2x2x1
jax: 0.10.0
libtpu: 0.0.40
codegen_flags: <defaults>
</compile_context>

<pallas_src>
import jax
import jax.numpy as jnp
from jax import lax
from jax.experimental import pallas as pl
from jax.experimental.pallas import tpu as pltpu

_LANE = 128
_SUBLANE = 8


def _multi_output_metric_kernel(logits_ref, act_ref, ttne_pred_ref, ttne_tgt_ref,
                                out_ref):
    """Per-row composite loss for one tile of rows.

    logits_ref    : (TN, C)     f32  unnormalized activity logits
    act_ref       : (1, 1, TN)  i32  activity class indices (lane-dense)
    ttne_pred_ref : (1, 1, TN)  f32  remaining-runtime predictions (lane-dense)
    ttne_tgt_ref  : (1, 1, TN)  f32  remaining-runtime targets (lane-dense)
    out_ref       : (1, 1, TN)  f32  composite loss components (lane-dense)
    """
    # One in-VMEM transpose (XLU) -> rows on lanes, classes on sublanes.
    # All subsequent VPU/EUP work is lane-dense even when C << 128.
    logits_t = jnp.swapaxes(logits_ref[...], 0, 1)          # (C, TN)
    tgt = act_ref[0]                                        # (1, TN) i32

    # Numerically stable logsumexp over the class (sublane) axis.
    m = jnp.max(logits_t, axis=0, keepdims=True)            # (1, TN)
    e = jnp.exp(logits_t - m)                               # (C, TN)
    lse = m + jnp.log(jnp.sum(e, axis=0, keepdims=True))    # (1, TN)

    # Gather logits[target] via a one-hot mask (class index iota along sublanes,
    # target broadcast along sublanes) — avoids per-row dynamic gather.
    cls = lax.broadcasted_iota(jnp.int32, logits_t.shape, 0)        # (C, TN)
    picked = jnp.sum(jnp.where(cls == tgt, logits_t, 0.0),
                     axis=0, keepdims=True)                         # (1, TN)
    ce = lse - picked                                               # (1, TN)

    # Mean-absolute-error component (element-wise, no reduction).
    mae = jnp.abs(ttne_pred_ref[0] - ttne_tgt_ref[0])               # (1, TN)

    out_ref[0] = ce + mae                                           # lane-dense store


def multi_output_metric(outputs, labels, *, tile_rows=None, interpret=False):
    """JAX/Pallas equivalent of MultiOutputMetric.forward.

    outputs : (logits (B,W,C) f32, ttne_pred (B,W,1) f32)
    labels  : (..., ttne_target (B,W,1) f32, activity_labels (B,W) int)
    returns : (B*W,) f32 composite loss components
    """
    logits, ttne_pred = outputs[0], outputs[1]
    act_labels = labels[-1]
    ttne_tgt = labels[-2]

    B, W, C = logits.shape
    N = B * W

    logits2 = logits.reshape(N, C).astype(jnp.float32)
    act1 = act_labels.reshape(N).astype(jnp.int32)
    pred1 = ttne_pred.reshape(N).astype(jnp.float32)
    tgt1 = ttne_tgt.reshape(N).astype(jnp.float32)

    # ---- Row-tile selection: biggest tile that fits a conservative VMEM budget. ----
    if tile_rows is None:
        c_lanes = pl.cdiv(C, _LANE) * _LANE          # lane-padded class dim in VMEM
        vmem_budget = 12 * 1024 * 1024               # double-buffered logits block budget
        tn = max(_LANE, min(512, vmem_budget // (2 * c_lanes * 4)))
        tn = (tn // _LANE) * _LANE                   # lane-aligned rows (dense after transpose)
        tn = min(tn, pl.cdiv(N, _LANE) * _LANE)      # don't exceed the padded problem size
    else:
        tn = tile_rows
    tn = max(_SUBLANE, (tn // _SUBLANE) * _SUBLANE)  # sublane alignment

    grid = pl.cdiv(N, tn)
    n_pad = grid * tn

    if n_pad != N:
        pad = n_pad - N
        logits2 = jnp.pad(logits2, ((0, pad), (0, 0)))
        act1 = jnp.pad(act1, (0, pad))
        pred1 = jnp.pad(pred1, (0, pad))
        tgt1 = jnp.pad(tgt1, (0, pad))

    # Lane-dense slabs for side inputs and the output: (grid, 1, TN) with (1, 1, TN) blocks.
    act3 = act1.reshape(grid, 1, tn)
    pred3 = pred1.reshape(grid, 1, tn)
    tgt3 = tgt1.reshape(grid, 1, tn)

    cost = pl.CostEstimate(
        flops=5 * n_pad * C,
        transcendentals=n_pad * C + n_pad,
        bytes_accessed=4 * n_pad * C + 16 * n_pad,
    )

    out = pl.pallas_call(
        _multi_output_metric_kernel,
        out_shape=jax.ShapeDtypeStruct((grid, 1, tn), jnp.float32),
        grid_spec=pltpu.PrefetchScalarGridSpec(
            num_scalar_prefetch=0,
            grid=(grid,),
            in_specs=[
                pl.BlockSpec((tn, C), lambda i: (i, 0)),
                pl.BlockSpec((1, 1, tn), lambda i: (i, 0, 0)),
                pl.BlockSpec((1, 1, tn), lambda i: (i, 0, 0)),
                pl.BlockSpec((1, 1, tn), lambda i: (i, 0, 0)),
            ],
            out_specs=pl.BlockSpec((1, 1, tn), lambda i: (i, 0, 0)),
        ),
        compiler_params=pltpu.CompilerParams(
            dimension_semantics=("parallel",),
            vmem_limit_bytes=32 * 1024 * 1024,
        ),
        cost_estimate=cost,
        interpret=interpret,
    )(logits2, act3, pred3, tgt3)

    return out.reshape(-1)[:N]


def _reference(outputs, labels):
    """Pure-JAX reference for verification."""
    logits, ttne_pred = outputs[0], outputs[1]
    act_labels = labels[-1]
    ttne_tgt = labels[-2]
    B, W, C = logits.shape
    lg = logits.reshape(-1, C).astype(jnp.float32)
    tg = act_labels.reshape(-1)
    ce = jax.nn.logsumexp(lg, axis=-1) - jnp.take_along_axis(
        lg, tg[:, None], axis=-1)[:, 0]
    mae = jnp.abs(ttne_pred.reshape(-1) - ttne_tgt.reshape(-1))
    return ce + mae


if __name__ == "__main__":
    B, W, C = 2, 64, 32          # batch, window (suffix length), num_classes
    key = jax.random.PRNGKey(0)
    k1, k2, k3, k4 = jax.random.split(key, 4)

    act_logits = jax.random.normal(k1, (B, W, C), dtype=jnp.float32)
    ttne_pred = jax.random.normal(k2, (B, W, 1), dtype=jnp.float32)
    act_labels = jax.random.randint(k3, (B, W), 0, C, dtype=jnp.int32)
    ttne_tgt = jax.random.normal(k4, (B, W, 1), dtype=jnp.float32)

    outputs = (act_logits, ttne_pred)
    # labels tuple has three entries; only the last two are used (like CRTP-LSTM).
    dummy_first_label = jnp.zeros((B, W), dtype=jnp.float32)
    labels = (dummy_first_label, ttne_tgt, act_labels)

    loss = multi_output_metric(outputs, labels)
    jax.block_until_ready(loss)

    ref = _reference(outputs, labels)
    assert loss.shape == (B * W,)
    assert jnp.allclose(loss, ref, atol=1e-5, rtol=1e-5), "mismatch vs reference"

    print("KERNEL_OK")
</pallas_src>

<mosaic_0001>
module attributes {stable_mosaic.version = 11 : i64} {
  func.func @_multi_output_metric_kernel(%arg0: i32, %arg1: memref<128x32xf32, #tpu.memory_space<vmem>>, %arg2: memref<1x1x128xi32, #tpu.memory_space<vmem>>, %arg3: memref<1x1x128xf32, #tpu.memory_space<vmem>>, %arg4: memref<1x1x128xf32, #tpu.memory_space<vmem>>, %arg5: memref<1x1x128xf32, #tpu.memory_space<vmem>>) attributes {dimension_semantics = [#tpu.dimension_semantics<parallel>], iteration_bounds = array<i64: 1>, scalar_prefetch = 0 : i64, scratch_operands = 0 : i64, tpu.core_type = #tpu.core_type<tc>, window_params = [{transform_indices = @transform_0, window_bounds = array<i64: 128, 32>}, {transform_indices = @transform_1, window_bounds = array<i64: 1, 1, 128>}, {transform_indices = @transform_2, window_bounds = array<i64: 1, 1, 128>}, {transform_indices = @transform_3, window_bounds = array<i64: 1, 1, 128>}, {transform_indices = @transform_4, window_bounds = array<i64: 1, 1, 128>}]} {
    %c0 = arith.constant 0 : index
    %c0_0 = arith.constant 0 : index
    %0 = vector.load %arg1[%c0, %c0_0] : memref<128x32xf32, #tpu.memory_space<vmem>>, vector<128x32xf32>
    %1 = tpu.transpose %0, [1, 0] : vector<128x32xf32> -> vector<32x128xf32>
    %c0_1 = arith.constant 0 : index
    %c0_2 = arith.constant 0 : index
    %c0_3 = arith.constant 0 : index
    %2 = vector.load %arg2[%c0_1, %c0_2, %c0_3] : memref<1x1x128xi32, #tpu.memory_space<vmem>>, vector<1x1x128xi32>
    %3 = vector.shape_cast %2 : vector<1x1x128xi32> to vector<1x128xi32>
    %cst = arith.constant dense<0xFF800000> : vector<128xf32>
    %4 = vector.multi_reduction <maximumf>, %1, %cst [0] : vector<32x128xf32> to vector<128xf32>
    %5 = vector.shape_cast %4 : vector<128xf32> to vector<1x128xf32>
    %6 = vector.broadcast %5 : vector<1x128xf32> to vector<32x128xf32>
    %7 = arith.subf %1, %6 : vector<32x128xf32>
    %8 = math.exp %7 : vector<32x128xf32>
    %cst_4 = arith.constant dense<0.000000e+00> : vector<128xf32>
    %9 = vector.multi_reduction <add>, %8, %cst_4 [0] : vector<32x128xf32> to vector<128xf32>
    %10 = vector.shape_cast %9 : vector<128xf32> to vector<1x128xf32>
    %11 = math.log %10 : vector<1x128xf32>
    %12 = arith.addf %5, %11 : vector<1x128xf32>
    %13 = tpu.iota {dimensions = array<i32: 0>} : vector<32x128xi32>
    %14 = vector.broadcast %3 : vector<1x128xi32> to vector<32x128xi32>
    %15 = arith.cmpi eq, %13, %14 : vector<32x128xi32>
    %cst_5 = arith.constant 0.000000e+00 : f32
    %16 = vector.broadcast %cst_5 : f32 to vector<32x128xf32>
    %17 = arith.select %15, %1, %16 : vector<32x128xi1>, vector<32x128xf32>
    %cst_6 = arith.constant dense<0.000000e+00> : vector<128xf32>
    %18 = vector.multi_reduction <add>, %17, %cst_6 [0] : vector<32x128xf32> to vector<128xf32>
    %19 = vector.shape_cast %18 : vector<128xf32> to vector<1x128xf32>
    %20 = arith.subf %12, %19 : vector<1x128xf32>
    %c0_7 = arith.constant 0 : index
    %c0_8 = arith.constant 0 : index
    %c0_9 = arith.constant 0 : index
    %21 = vector.load %arg3[%c0_7, %c0_8, %c0_9] : memref<1x1x128xf32, #tpu.memory_space<vmem>>, vector<1x1x128xf32>
    %22 = vector.shape_cast %21 : vector<1x1x128xf32> to vector<1x128xf32>
    %c0_10 = arith.constant 0 : index
    %c0_11 = arith.constant 0 : index
    %c0_12 = arith.constant 0 : index
    %23 = vector.load %arg4[%c0_10, %c0_11, %c0_12] : memref<1x1x128xf32, #tpu.memory_space<vmem>>, vector<1x1x128xf32>
    %24 = vector.shape_cast %23 : vector<1x1x128xf32> to vector<1x128xf32>
    %25 = arith.subf %22, %24 : vector<1x128xf32>
    %26 = math.absf %25 : vector<1x128xf32>
    %27 = arith.addf %20, %26 : vector<1x128xf32>
    %c0_13 = arith.constant 0 : index
    %c0_14 = arith.constant 0 : index
    %c0_15 = arith.constant 0 : index
    %28 = vector.load %arg5[%c0_13, %c0_14, %c0_15] : memref<1x1x128xf32, #tpu.memory_space<vmem>>, vector<1x1x128xf32>
    %29 = vector.shape_cast %28 : vector<1x1x128xf32> to vector<1x128xf32>
    %30 = vector.shape_cast %27 : vector<1x128xf32> to vector<1x1x128xf32>
    tpu.vector_store %arg5[%c0_13, %c0_14, %c0_15], %30 {strides = array<i32>} : memref<1x1x128xf32, #tpu.memory_space<vmem>>, vector<1x1x128xf32>,
    return
  }
  func.func @transform_0(%arg0: i32) -> (i32, i32) {
    %c0_i32 = arith.constant 0 : i32
    %c0_i32_0 = arith.constant 0 : i32
    return %arg0, %c0_i32 : i32, i32
  }
  func.func @transform_1(%arg0: i32) -> (i32, i32, i32) {
    %c0_i32 = arith.constant 0 : i32
    %c0_i32_0 = arith.constant 0 : i32
    %c0_i32_1 = arith.constant 0 : i32
    return %arg0, %c0_i32, %c0_i32_0 : i32, i32, i32
  }
  func.func @transform_2(%arg0: i32) -> (i32, i32, i32) {
    %c0_i32 = arith.constant 0 : i32
    %c0_i32_0 = arith.constant 0 : i32
    %c0_i32_1 = arith.constant 0 : i32
    return %arg0, %c0_i32, %c0_i32_0 : i32, i32, i32
  }
  func.func @transform_3(%arg0: i32) -> (i32, i32, i32) {
    %c0_i32 = arith.constant 0 : i32
    %c0_i32_0 = arith.constant 0 : i32
    %c0_i32_1 = arith.constant 0 : i32
    return %arg0, %c0_i32, %c0_i32_0 : i32, i32, i32
  }
  func.func @transform_4(%arg0: i32) -> (i32, i32, i32) {
    %c0_i32 = arith.constant 0 : i32
    %c0_i32_0 = arith.constant 0 : i32
    %c0_i32_1 = arith.constant 0 : i32
    return %arg0, %c0_i32, %c0_i32_0 : i32, i32, i32
  }
}

</mosaic_0001>

<bundles_post_ra>
// kernel: tpu_custom_call.1
= control target key start
LH: loop header
LB: loop body
LE: loop exit
PB: predicated region body
PF: predicated region fallthrough
CT: control target
= control target key end

     0   :  { %s278_s0 = inlined_call_operand.vmem [shape: f32[128,32], index: 0, kind: input, shape index: {}]   ;;  %s279_s1 = inlined_call_operand.vmem [shape: s32[1,1,128], index: 1, kind: input, shape index: {}]   ;;  %s280_s2 = inlined_call_operand.vmem [shape: f32[1,1,128], index: 2, kind: input, shape index: {}]   ;;  %s281_s3 = inlined_call_operand.vmem [shape: f32[1,1,128], index: 3, kind: input, shape index: {}]   ;;  %s282_s4 = inlined_call_operand.hbm [shape: f32[1,1,128], index: 4, kind: output, shape index: {}]  }
   0x1   :  { %v18_v0 = vld [vmem:[%s278_s0] sm:$0xff]  ;;  %v19_v1 = vld [vmem:[%s278_s0 + $0x8] sm:$0xff] }
   0x2   :  { %34 = vxpose.xlu0.b32.start [1/16] (narrow) %v18_v0, 32 }
   0x6   :  { %35 = vxpose.xlu0.b32.cont [2/16] (narrow) %v19_v1, 32 }
   0x7   :  { %9 = vsyncpa [#allocation3], 0  ;;  %v20_v2 = vld [vmem:[%s278_s0 + $0x10] sm:$0xff]  ;;  %v21_v3 = vld [vmem:[%s278_s0 + $0x18] sm:$0xff]  ;;  %v100_v35 = vlaneseq  ;;  %s183_s25 = smov [#allocation2]  }
   0x8   :  { %v22_v4 = vld [vmem:[%s278_s0 + $0x20] sm:$0xff]  ;;  %v23_v5 = vld [vmem:[%s278_s0 + $0x28] sm:$0xff]  ;;  %v24_v6 = vld [vmem:[%s278_s0 + $0x30] sm:$0xff]  ;;  %s139_s26 = sshll.u32 %s183_s25, 4  ;;  %s140_s26 = int_to_ptr.vmem [resolvable:$true] %s139_s26 }
   0x9   :  { %v25_v7 = vld [vmem:[%s278_s0 + $0x38] sm:$0xff]  ;;  %v26_v8 = vld [vmem:[%s278_s0 + $0x40] sm:$0xff]  ;;  %v27_v9 = vld [vmem:[%s278_s0 + $0x48] sm:$0xff]  ;;  %v101_v38 = vshrl.u32 %v100_v35, 7  ;;  %s159_s27 = scalar_lea.vmem %s140_s26, 16  ;;  %p164_p1 = scmp.lt.s32.totalorder %s140_s26, %s140_s26 }
   0xa   :  { %36 = vxpose.xlu0.b32.cont [3/16] (narrow) %v20_v2, 32  ;;  %v28_v10 = vld [vmem:[%s278_s0 + $0x50] sm:$0xff]  ;;  %v29_v11 = vld [vmem:[%s278_s0 + $0x58] sm:$0xff]  ;;  %v30_v12 = vld [vmem:[%s278_s0 + $0x60] sm:$0xff]  ;;  %p160_p0 = scmp.ne.s32.totalorder %s140_s26, %s159_s27 }
   0xb   :  { %v31_v13 = vld [vmem:[%s278_s0 + $0x68] sm:$0xff]  ;;  %v32_v14 = vld [vmem:[%s278_s0 + $0x70] sm:$0xff]  ;;  %v33_v15 = vld [vmem:[%s278_s0 + $0x78] sm:$0xff]  ;;  %v102_v39 = vadd.s32 8, %v101_v38  ;;  %v103_v40 = vadd.s32 16, %v101_v38  ;;  %v104_v42 = vadd.s32 24, %v101_v38 }
   0xc   :  { %v147_v41 = vld [vmem:[%s279_s1] ss:$0 sm:$0xff] }
   0xd   :  { %vm110_vm0 = vcmp.eq.s32.totalorder %v102_v39, %v147_v41  ;;  %vm109_vm1 = vcmp.eq.s32.totalorder %v101_v38, %v147_v41  ;;  %vm111_vm2 = vcmp.eq.s32.totalorder %v103_v40, %v147_v41  ;;  %vm112_vm3 = vcmp.eq.s32.totalorder %v104_v42, %v147_v41 }
   0xe   :  { %37 = vxpose.xlu0.b32.cont [4/16] (narrow) %v21_v3, 32  ;;  %v127_v3 = vld [vmem:[%s280_s2] sm:$0x1]  ;;  %s163_s2 = scalar_lea.vmem %s140_s26, 32 }
   0xf   :  { %p165_p2 = scmp.lt.s32.totalorder %s163_s2, %s159_s27 }
  0x11   :  { %p166_p3 = por %p165_p2, %p164_p1 }
  0x12   :  { %38 = vxpose.xlu0.b32.cont [5/16] (narrow) %v22_v4, 32  ;;  %v128_v4 = vld [vmem:[%s281_s3] sm:$0x1] }
  0x13   :  { %p167_p4 = pnand %p166_p3, %p160_p0 }
  0x16   :  { %39 = vxpose.xlu0.b32.cont [6/16] (narrow) %v23_v5, 32 }
  0x1a   :  { %40 = vxpose.xlu0.b32.cont [7/16] (narrow) %v24_v6, 32  ;;  %v129_v6 = vsub.f32 %v127_v3, %v128_v4 }
  0x1e   :  { %41 = vxpose.xlu0.b32.cont [8/16] (narrow) %v25_v7, 32 }
  0x22   :  { %42 = vxpose.xlu0.b32.cont [9/16] (narrow) %v26_v8, 32 }
  0x26   :  { %43 = vxpose.xlu0.b32.cont [10/16] (narrow) %v27_v9, 32 }
  0x2a   :  { %44 = vxpose.xlu0.b32.cont [11/16] (narrow) %v28_v10, 32 }
  0x2e   :  { %45 = vxpose.xlu0.b32.cont [12/16] (narrow) %v29_v11, 32  ;;  %v130_v11 = vand.u32 2147483647, %v129_v6 }
  0x32   :  { %46 = vxpose.xlu0.b32.cont [13/16] (narrow) %v30_v12, 32 }
  0x36   :  { %47 = vxpose.xlu0.b32.cont [14/16] (narrow) %v31_v13, 32 }
  0x3a   :  { %48 = vxpose.xlu0.b32.cont [15/16] (narrow) %v32_v14, 32 }
  0x3e   :  { %49 = vxpose.xlu0.b32.end [16/16] (narrow) %v33_v15, 32 }
  0x82   :  { %v50_v16 = vpop.trf.xlu0 }
  0x83   :  { %v113_v48 = vsel %vm109_vm1, %v50_v16, 0.0 }
  0x86   :  { %v51_v17 = vpop.trf.xlu0 }
  0x87   :  { %v67_v20 = vmax.f32 %v50_v16, %v51_v17  ;;  %v114_v45 = vsel %vm110_vm0, %v51_v17, 0.0 }
  0x88   :  { %v117_v52 = vadd.f32 %v114_v45, %v113_v48 }
  0x8a   :  { %v52_v18 = vpop.trf.xlu0 }
  0x8b   :  { %v115_v49 = vsel %vm111_vm2, %v52_v18, 0.0 }
  0x8c   :  { %v118_v55 = vadd.f32 %v117_v52, %v115_v49 }
  0x8e   :  { %v53_v19 = vpop.trf.xlu0 }
  0x8f   :  { %v68_v21 = vmax.f32 %v52_v18, %v53_v19  ;;  %v116_v54 = vsel %vm112_vm3, %v53_v19, 0.0 }
  0x90   :  { %v119_v57 = vadd.f32 %v118_v55, %v116_v54 }
  0x91   :  { %v69_v22 = vmax.f32 %v67_v20, %v68_v21 }
  0x92   :  { %v120_v60 = vrot.slane %v119_v57, 4 }
  0x93   :  { %v70_v23 = vrot.slane %v69_v22, 4 }
  0x94   :  { %v121_v63 = vadd.f32 %v120_v60, %v119_v57 }
  0x95   :  { %v71_v24 = vmax.f32 %v69_v22, %v70_v23 }
  0x96   :  { %v122_v1 = vrot.slane %v121_v63, 2 }
  0x97   :  { %v72_v25 = vrot.slane %v71_v24, 2 }
  0x98   :  { %v123_v2 = vadd.f32 %v122_v1, %v121_v63 }
  0x99   :  { %v73_v26 = vmax.f32 %v71_v24, %v72_v25 }
  0x9a   :  { %v124_v5 = vrot.slane %v123_v2, 1 }
  0x9b   :  { %v74_v27 = vrot.slane %v73_v26, 1 }
  0x9c   :  { %v125_v10 = vadd.f32 %v124_v5, %v123_v2 }
  0x9d   :  { %v75_v28 = vmax.f32 %v73_v26, %v74_v27 }
  0x9f   :  { %v76_v29 = vsub.f32 %v50_v16, %v75_v28  ;;  %v77_v30 = vsub.f32 %v51_v17, %v75_v28  ;;  %v78_v31 = vsub.f32 %v52_v18, %v75_v28  ;;  %v79_v32 = vsub.f32 %v53_v19, %v75_v28 }
  0xa1   :  { %v80_v33 = vmul.f32 1.442695, %v76_v29  ;;  %v82_v34 = vmul.f32 1.442695, %v77_v30  ;;  %v84_v36 = vmul.f32 1.442695, %v78_v31 }
  0xa2   :  { %v86_v37 = vmul.f32 1.442695, %v79_v32 }
  0xa3   :  { %149 = vpow2.f32 %v80_v33 }
  0xa4   :  { %151 = vpow2.f32 %v82_v34 }
  0xa5   :  { %153 = vpow2.f32 %v84_v36 }
  0xa6   :  { %155 = vpow2.f32 %v86_v37 }
  0xad   :  { %v150_v43 = vpop.eup %149 }
  0xae   :  { %v152_v44 = vpop.eup %151 }
  0xaf   :  { %v88_v46 = vadd.f32 %v152_v44, %v150_v43  ;;  %v154_v47 = vpop.eup %153 }
  0xb0   :  { %v156_v51 = vpop.eup %155 }
  0xb1   :  { %v89_v50 = vadd.f32 %v154_v47, %v88_v46 }
  0xb3   :  { %v90_v53 = vadd.f32 %v156_v51, %v89_v50 }
  0xb5   :  { %v91_v56 = vrot.slane %v90_v53, 4 }
  0xb7   :  { %v92_v58 = vadd.f32 %v91_v56, %v90_v53 }
  0xb9   :  { %v93_v59 = vrot.slane %v92_v58, 2 }
  0xbb   :  { %v94_v61 = vadd.f32 %v93_v59, %v92_v58 }
  0xbd   :  { %v95_v62 = vrot.slane %v94_v61, 1 }
  0xbf   :  { %v96_v0 = vadd.f32 %v95_v62, %v94_v61 }
  0xc1   :  { %157 = vlog2.f32 %v96_v0 }
  0xcb   :  { %v158_v7 = vpop.eup %157 }
  0xcc   :  { %v98_v8 = vmul.f32 0.6931472, %v158_v7 }
  0xce   :  { %v99_v9 = vadd.f32 %v98_v8, %v75_v28 }
  0xd0   :  { %v126_v12 = vsub.f32 %v99_v9, %v125_v10 }
  0xd2   :  { %v131_v13 = vadd.f32 %v130_v11, %v126_v12 }
  0xd4   :  { %132 = vst [vmem:[#allocation2] sm:$0x1] %v131_v13 }
  0xd5   :  { %170 = shalt.err (!%p167_p4)
}
  0xd6   :  { %s171_s29 = scalar_lea.hbm %s282_s4, 16 }
  0xd7   :  { %p172_p5 = scmp.ne.s32.totalorder %s282_s4, %s171_s29  ;;  %p175_p6 = scmp.lt.u32.totalorder %s171_s29, %s282_s4 }
  0xd9   :  { %p177_p7 = pnand %p175_p6, %p172_p5 }
  0xdb   :  { %180 = shalt.err (!%p177_p7)
}
  0xdc   :  { %142 = dma.vmem_to_hbm [thread:$0]  %s140_s26, 16, %s282_s4, [#allocation3]  }
  0xdd   :  { %181 = dma.done.wait [#allocation3], 16  }
  0xde   :  { %182 = vsyncadd [#allocation3], 4294967280 }
  0xdf   :  { %146 = vsyncpa [#allocation3], 1 }

</bundles_post_ra>
